<compile_context>
chip_gen: v7x
topology: tpu7x:2x2x1
jax: 0.10.0
libtpu: 0.0.40
codegen_flags: <defaults>
</compile_context>

<pallas_src>
import functools

import jax
import jax.numpy as jnp
from jax import lax
from jax.experimental import pallas as pl
from jax.experimental.pallas import tpu as pltpu


# ---------------------------------------------------------------------------
# Pallas kernel: LSTM recurrence over pre-projected gates
# ---------------------------------------------------------------------------
def _lstm_rnn_kernel(gates_ref, whh_hbm, out_ref, hT_ref, cT_ref,
                     whh_vmem, h_sc, c_sc, dma_sem,
                     *, hidden, chunk, seq_len):
    """Grid = (batch_blocks, time_chunks).
       gates_ref : (chunk, Bb, 4H) f32   pre-projected x@W_ih^T + b for chunk t
       whh_hbm   : (H, 4H) bf16          recurrent weights, left in HBM (ANY)
       out_ref   : (chunk, Bb, H) f32    hidden outputs for this chunk
       hT_ref    : (Bb, H) f32           final hidden state (written at last t)
       cT_ref    : (Bb, H) f32           final cell state
       whh_vmem  : VMEM (H, 4H) bf16     single-buffered weight copy
       h_sc/c_sc : VMEM (Bb, H) f32      state carried across time chunks."""
    t = pl.program_id(1)
    H = hidden

    @pl.when(t == 0)
    def _():
        # Load W_hh once per batch block (single VMEM copy, no double buffer)
        # and reset the recurrent state.
        cp = pltpu.make_async_copy(whh_hbm, whh_vmem, dma_sem)
        cp.start()
        cp.wait()
        h_sc[...] = jnp.zeros_like(h_sc)
        c_sc[...] = jnp.zeros_like(c_sc)

    whh = whh_vmem[...]              # hoisted out of the inner loop
    t0 = t * chunk
    has_tail = (seq_len % chunk) != 0   # static: masking only if time is padded

    def step(i, carry):
        h, c = carry                                     # (Bb, H) f32
        g = gates_ref[i] + jnp.dot(h.astype(jnp.bfloat16), whh,
                                   preferred_element_type=jnp.float32)
        # PyTorch gate order: i, f, g, o
        i_g = jax.nn.sigmoid(g[:, 0 * H:1 * H])
        f_g = jax.nn.sigmoid(g[:, 1 * H:2 * H])
        g_g = jnp.tanh(g[:, 2 * H:3 * H])
        o_g = jax.nn.sigmoid(g[:, 3 * H:4 * H])
        c_new = f_g * c + i_g * g_g
        h_new = o_g * jnp.tanh(c_new)
        if has_tail:
            valid = (t0 + i) < seq_len
            h_new = jnp.where(valid, h_new, h)
            c_new = jnp.where(valid, c_new, c)
        out_ref[i] = h_new.astype(out_ref.dtype)
        return h_new, c_new

    h_fin, c_fin = lax.fori_loop(0, chunk, step,
                                 (h_sc[...], c_sc[...]), unroll=True)
    h_sc[...] = h_fin
    c_sc[...] = c_fin

    @pl.when(t == pl.num_programs(1) - 1)
    def _():
        hT_ref[...] = h_fin.astype(hT_ref.dtype)
        cT_ref[...] = c_fin.astype(cT_ref.dtype)


# ---------------------------------------------------------------------------
# One LSTM layer, time-major in / time-major out
# ---------------------------------------------------------------------------
def lstm_layer_pallas_tm(x_tbd, w_ih, w_hh, b_ih, b_hh, *,
                         chunk=32, batch_block=None):
    """x_tbd: (T, B, D) f32 time-major.  Weights in PyTorch layout:
       w_ih (4H, D), w_hh (4H, H), biases (4H,).
       Returns (out (T, B, H) f32, hT (B, H), cT (B, H))."""
    T, B, D = x_tbd.shape
    H = w_hh.shape[1]

    # ---- hoisted input projection: one big bf16 GEMM on the MXU (XLA) ----
    wih_b = jnp.transpose(w_ih).astype(jnp.bfloat16)          # (D, 4H)
    whh_b = jnp.transpose(w_hh).astype(jnp.bfloat16)          # (H, 4H)
    bias = (b_ih + b_hh).astype(jnp.float32)                  # (4H,)
    gates_x = jnp.dot(x_tbd.reshape(T * B, D).astype(jnp.bfloat16), wih_b,
                      preferred_element_type=jnp.float32)
    gates_x = gates_x.reshape(T, B, 4 * H) + bias              # (T, B, 4H) f32

    # ---- pad batch to sublane multiple, time to chunk multiple ----
    # NOTE: for production sizes choose H a multiple of 128 so gate slices and
    # output stores are lane-aligned; here H=32 is the module's hidden size.
    Bp = ((B + 7) // 8) * 8
    TC = max(1, min(chunk, T))
    Tp = ((T + TC - 1) // TC) * TC
    if Bp != B or Tp != T:
        gates_x = jnp.pad(gates_x, ((0, Tp - T), (0, Bp - B), (0, 0)))

    Bb = batch_block if batch_block is not None else Bp
    if Bb <= 0 or (Bp % Bb) != 0 or (Bb % 8) != 0:
        Bb = Bp
    nb, nt = Bp // Bb, Tp // TC

    kernel = functools.partial(_lstm_rnn_kernel, hidden=H, chunk=TC, seq_len=T)

    out_tbh, hT, cT = pl.pallas_call(
        kernel,
        out_shape=(
            jax.ShapeDtypeStruct((Tp, Bp, H), jnp.float32),
            jax.ShapeDtypeStruct((Bp, H), jnp.float32),
            jax.ShapeDtypeStruct((Bp, H), jnp.float32),
        ),
        grid_spec=pltpu.PrefetchScalarGridSpec(
            num_scalar_prefetch=0,
            grid=(nb, nt),
            in_specs=[
                pl.BlockSpec((TC, Bb, 4 * H), lambda b, t: (t, b, 0)),
                pl.BlockSpec(memory_space=pl.ANY),       # W_hh stays in HBM
            ],
            out_specs=[
                pl.BlockSpec((TC, Bb, H), lambda b, t: (t, b, 0)),
                pl.BlockSpec((Bb, H), lambda b, t: (b, 0)),
                pl.BlockSpec((Bb, H), lambda b, t: (b, 0)),
            ],
            scratch_shapes=[
                pltpu.VMEM((H, 4 * H), jnp.bfloat16),    # single-buffered W_hh
                pltpu.VMEM((Bb, H), jnp.float32),        # h carry
                pltpu.VMEM((Bb, H), jnp.float32),        # c carry
                pltpu.SemaphoreType.DMA,
            ],
        ),
        compiler_params=pltpu.CompilerParams(
            dimension_semantics=("parallel", "arbitrary"),
            vmem_limit_bytes=64 * 1024 * 1024,
        ),
    )(gates_x, whh_b)

    return out_tbh[:T, :B, :], hT[:B], cT[:B]


# ---------------------------------------------------------------------------
# BaseMultiLayerRNN forward (rnn_type='lstm', bidirectional=False,
# lengths=None, initial_state=None, concat_layers=True, p_dropout=0 -> identity)
# ---------------------------------------------------------------------------
def base_multilayer_rnn_forward(inputs, params, *, chunk=32, batch_block=None):
    """inputs: (B, T, input_size) batch_first. params: list of per-layer dicts.
       Returns (outputs (B, T, H*num_layers), (h_n, c_n))."""
    # Time-major once for the whole stack (no per-layer transposes).
    x_tbd = jnp.transpose(inputs, (1, 0, 2)).astype(jnp.float32)
    outs, hs, cs = [], [], []
    for p in params:
        # TODO(synk): VariationalDropout with p>0 would apply a per-batch mask;
        # with input_drop_prob=0.0 it is the identity.
        out, hT, cT = lstm_layer_pallas_tm(x_tbd, p["w_ih"], p["w_hh"],
                                           p["b_ih"], p["b_hh"],
                                           chunk=chunk, batch_block=batch_block)
        outs.append(out)
        hs.append(hT)
        cs.append(cT)
        x_tbd = out
    outputs = jnp.transpose(jnp.concatenate(outs, axis=-1), (1, 0, 2))
    return outputs, (jnp.stack(hs, 0), jnp.stack(cs, 0))


# ---------------------------------------------------------------------------
# Pure-JAX references
# ---------------------------------------------------------------------------
def _lstm_layer_ref(x_tbd, w_ih, w_hh, b_ih, b_hh, *, bf16):
    """If bf16=True, mirrors the kernel's precision exactly (bf16 weights and
       matmul inputs, f32 accumulation / gate math)."""
    H = w_hh.shape[1]
    wdt = jnp.bfloat16 if bf16 else jnp.float32
    wih_t = jnp.transpose(w_ih).astype(wdt)
    whh_t = jnp.transpose(w_hh).astype(wdt)
    bias = (b_ih + b_hh).astype(jnp.float32)

    def step(carry, x_t):
        h, c = carry
        g = (jnp.dot(x_t.astype(wdt), wih_t, preferred_element_type=jnp.float32)
             + bias
             + jnp.dot(h.astype(wdt), whh_t, preferred_element_type=jnp.float32))
        i = jax.nn.sigmoid(g[:, 0 * H:1 * H])
        f = jax.nn.sigmoid(g[:, 1 * H:2 * H])
        gg = jnp.tanh(g[:, 2 * H:3 * H])
        o = jax.nn.sigmoid(g[:, 3 * H:4 * H])
        c = f * c + i * gg
        h = o * jnp.tanh(c)
        return (h, c), h

    B = x_tbd.shape[1]
    h0 = jnp.zeros((B, H), jnp.float32)
    (hT, cT), out = lax.scan(step, (h0, h0), x_tbd)
    return out, hT, cT


def _ref_forward(inputs, params, *, bf16):
    x = jnp.transpose(inputs, (1, 0, 2)).astype(jnp.float32)
    outs, hs, cs = [], [], []
    for p in params:
        o, h, c = _lstm_layer_ref(x, p["w_ih"], p["w_hh"], p["b_ih"], p["b_hh"],
                                  bf16=bf16)
        outs.append(o)
        hs.append(h)
        cs.append(c)
        x = o
    outputs = jnp.transpose(jnp.concatenate(outs, -1), (1, 0, 2))
    return outputs, (jnp.stack(hs, 0), jnp.stack(cs, 0))


# ---------------------------------------------------------------------------
# Main
# ---------------------------------------------------------------------------
if __name__ == "__main__":
    B, T, D, H, NUM_LAYERS = 2, 8, 16, 32, 2

    key = jax.random.PRNGKey(0)
    k_in, key = jax.random.split(key)
    inputs = jax.random.normal(k_in, (B, T, D), dtype=jnp.float32)

    # Deterministic PyTorch-style init: uniform(-1/sqrt(H), 1/sqrt(H)).
    bound = 1.0 / float(jnp.sqrt(jnp.float32(H)))
    params = []
    in_size = D
    for _ in range(NUM_LAYERS):
        k1, k2, k3, k4, key = jax.random.split(key, 5)
        params.append(dict(
            w_ih=jax.random.uniform(k1, (4 * H, in_size), jnp.float32, -bound, bound),
            w_hh=jax.random.uniform(k2, (4 * H, H), jnp.float32, -bound, bound),
            b_ih=jax.random.uniform(k3, (4 * H,), jnp.float32, -bound, bound),
            b_hh=jax.random.uniform(k4, (4 * H,), jnp.float32, -bound, bound),
        ))
        in_size = H  # unidirectional -> next layer input size = hidden_size

    fwd = jax.jit(base_multilayer_rnn_forward)
    outputs, (h_n, c_n) = fwd(inputs, params)
    jax.block_until_ready((outputs, h_n, c_n))

    assert outputs.shape == (B, T, H * NUM_LAYERS)
    assert h_n.shape == (NUM_LAYERS, B, H) and c_n.shape == (NUM_LAYERS, B, H)

    # 1) Precision-mirrored reference (same bf16/f32 placement as the kernel).
    m_out, (m_h, m_c) = _ref_forward(inputs, params, bf16=True)
    assert jnp.allclose(outputs, m_out, atol=2e-3, rtol=2e-3)
    assert jnp.allclose(h_n, m_h, atol=2e-3, rtol=2e-3)
    assert jnp.allclose(c_n, m_c, atol=2e-3, rtol=2e-3)

    # 2) Loose semantic check against a pure-f32 LSTM reference.
    f_out, (f_h, f_c) = _ref_forward(inputs, params, bf16=False)
    assert float(jnp.max(jnp.abs(outputs - f_out))) < 0.15
    assert float(jnp.max(jnp.abs(h_n - f_h))) < 0.15
    assert float(jnp.max(jnp.abs(c_n - f_c))) < 0.15

    print("KERNEL_OK")
</pallas_src>

<mosaic_0001>
module attributes {stable_mosaic.version = 11 : i64} {
  func.func @_lstm_rnn_kernel(%arg0: i32, %arg1: i32, %arg2: memref<8x8x128xf32, #tpu.memory_space<vmem>>, %arg3: memref<32x128xbf16, #tpu.memory_space<any>>, %arg4: memref<8x8x32xf32, #tpu.memory_space<vmem>>, %arg5: memref<8x32xf32, #tpu.memory_space<vmem>>, %arg6: memref<8x32xf32, #tpu.memory_space<vmem>>, %arg7: memref<32x128xbf16, #tpu.memory_space<vmem>>, %arg8: memref<8x32xf32, #tpu.memory_space<vmem>>, %arg9: memref<8x32xf32, #tpu.memory_space<vmem>>, %arg10: memref<!tpu.dma_semaphore, #tpu.memory_space<semaphore_mem>>) attributes {dimension_semantics = [#tpu.dimension_semantics<parallel>, #tpu.dimension_semantics<arbitrary>], iteration_bounds = array<i64: 1, 1>, scalar_prefetch = 0 : i64, scratch_operands = 4 : i64, tpu.core_type = #tpu.core_type<tc>, window_params = [{transform_indices = @transform_0, window_bounds = array<i64: 8, 8, 128>}, {}, {transform_indices = @transform_2, window_bounds = array<i64: 8, 8, 32>}, {transform_indices = @transform_3, window_bounds = array<i64: 8, 32>}, {transform_indices = @transform_4, window_bounds = array<i64: 8, 32>}]} {
    %c0_i32 = arith.constant 0 : i32
    %0 = arith.cmpi eq, %arg1, %c0_i32 : i32
    %1 = arith.extui %0 : i1 to i32
    %c0_i32_0 = arith.constant 0 : i32
    %2 = arith.cmpi ne, %1, %c0_i32_0 : i32
    scf.if %2 {
      tpu.enqueue_dma source(%arg3 : memref<32x128xbf16, #tpu.memory_space<any>>) target(%arg7 : memref<32x128xbf16, #tpu.memory_space<vmem>>) target_semaphore(%arg10 : memref<!tpu.dma_semaphore, #tpu.memory_space<semaphore_mem>>)
      tpu.wait_dma2 semaphore(%arg10 : memref<!tpu.dma_semaphore, #tpu.memory_space<semaphore_mem>>) src(%arg3 : memref<32x128xbf16, #tpu.memory_space<any>>) dst(%arg7 : memref<32x128xbf16, #tpu.memory_space<vmem>>)
      %cst_76 = arith.constant 0.000000e+00 : f32
      %291 = vector.broadcast %cst_76 : f32 to vector<8x32xf32>
      %c0_77 = arith.constant 0 : index
      %c0_78 = arith.constant 0 : index
      %292 = vector.load %arg8[%c0_77, %c0_78] : memref<8x32xf32, #tpu.memory_space<vmem>>, vector<8x32xf32>
      tpu.vector_store %arg8[%c0_77, %c0_78], %291 {strides = array<i32>} : memref<8x32xf32, #tpu.memory_space<vmem>>, vector<8x32xf32>,
      %cst_79 = arith.constant 0.000000e+00 : f32
      %293 = vector.broadcast %cst_79 : f32 to vector<8x32xf32>
      %c0_80 = arith.constant 0 : index
      %c0_81 = arith.constant 0 : index
      %294 = vector.load %arg9[%c0_80, %c0_81] : memref<8x32xf32, #tpu.memory_space<vmem>>, vector<8x32xf32>
      tpu.vector_store %arg9[%c0_80, %c0_81], %293 {strides = array<i32>} : memref<8x32xf32, #tpu.memory_space<vmem>>, vector<8x32xf32>,
    } else {
    }
    %c0 = arith.constant 0 : index
    %c0_1 = arith.constant 0 : index
    %3 = vector.load %arg7[%c0, %c0_1] : memref<32x128xbf16, #tpu.memory_space<vmem>>, vector<32x128xbf16>
    %c0_2 = arith.constant 0 : index
    %c0_3 = arith.constant 0 : index
    %4 = vector.load %arg8[%c0_2, %c0_3] : memref<8x32xf32, #tpu.memory_space<vmem>>, vector<8x32xf32>
    %c0_4 = arith.constant 0 : index
    %c0_5 = arith.constant 0 : index
    %5 = vector.load %arg9[%c0_4, %c0_5] : memref<8x32xf32, #tpu.memory_space<vmem>>, vector<8x32xf32>
    %c0_i32_6 = arith.constant 0 : i32
    %6 = arith.index_cast %c0_i32_6 : i32 to index
    %c0_7 = arith.constant 0 : index
    %c0_8 = arith.constant 0 : index
    %7 = vector.load %arg2[%6, %c0_7, %c0_8] : memref<8x8x128xf32, #tpu.memory_space<vmem>>, vector<1x8x128xf32>
    %8 = vector.shape_cast %7 : vector<1x8x128xf32> to vector<8x128xf32>
    %9 = arith.truncf %4 : vector<8x32xf32> to vector<8x32xbf16>
    %cst = arith.constant dense<0.000000e+00> : vector<8x128xf32>
    %10 = tpu.matmul %9, %3, %cst {dimension_numbers = #tpu.dot_dimension_numbers<[1], [0], [0], [1], [0, 0, 1, 1], [], []>} : vector<8x32xbf16>, vector<32x128xbf16>, vector<8x128xf32> -> vector<8x128xf32>
    %11 = arith.addf %8, %10 : vector<8x128xf32>
    %12 = vector.extract_strided_slice %11 {offsets = [0, 0], sizes = [8, 32], strides = [1, 1]} : vector<8x128xf32> to vector<8x32xf32>
    %13 = arith.negf %12 : vector<8x32xf32>
    %14 = math.exp %13 : vector<8x32xf32>
    %cst_9 = arith.constant 1.000000e+00 : f32
    %15 = vector.broadcast %cst_9 : f32 to vector<8x32xf32>
    %16 = arith.addf %15, %14 : vector<8x32xf32>
    %17 = arith.divf %15, %16 : vector<8x32xf32>
    %18 = vector.extract_strided_slice %11 {offsets = [0, 32], sizes = [8, 32], strides = [1, 1]} : vector<8x128xf32> to vector<8x32xf32>
    %19 = arith.negf %18 : vector<8x32xf32>
    %20 = math.exp %19 : vector<8x32xf32>
    %cst_10 = arith.constant 1.000000e+00 : f32
    %21 = vector.broadcast %cst_10 : f32 to vector<8x32xf32>
    %22 = arith.addf %21, %20 : vector<8x32xf32>
    %23 = arith.divf %21, %22 : vector<8x32xf32>
    %24 = vector.extract_strided_slice %11 {offsets = [0, 64], sizes = [8, 32], strides = [1, 1]} : vector<8x128xf32> to vector<8x32xf32>
    %25 = math.tanh %24 : vector<8x32xf32>
    %26 = vector.extract_strided_slice %11 {offsets = [0, 96], sizes = [8, 32], strides = [1, 1]} : vector<8x128xf32> to vector<8x32xf32>
    %27 = arith.negf %26 : vector<8x32xf32>
    %28 = math.exp %27 : vector<8x32xf32>
    %cst_11 = arith.constant 1.000000e+00 : f32
    %29 = vector.broadcast %cst_11 : f32 to vector<8x32xf32>
    %30 = arith.addf %29, %28 : vector<8x32xf32>
    %31 = arith.divf %29, %30 : vector<8x32xf32>
    %32 = arith.mulf %23, %5 : vector<8x32xf32>
    %33 = arith.mulf %17, %25 : vector<8x32xf32>
    %34 = arith.addf %32, %33 : vector<8x32xf32>
    %35 = math.tanh %34 : vector<8x32xf32>
    %36 = arith.mulf %31, %35 : vector<8x32xf32>
    %37 = arith.index_cast %c0_i32_6 : i32 to index
    %c0_12 = arith.constant 0 : index
    %c0_13 = arith.constant 0 : index
    %38 = vector.load %arg4[%37, %c0_12, %c0_13] : memref<8x8x32xf32, #tpu.memory_space<vmem>>, vector<1x8x32xf32>
    %39 = vector.shape_cast %38 : vector<1x8x32xf32> to vector<8x32xf32>
    %40 = vector.shape_cast %36 : vector<8x32xf32> to vector<1x8x32xf32>
    tpu.vector_store %arg4[%37, %c0_12, %c0_13], %40 {strides = array<i32>} : memref<8x8x32xf32, #tpu.memory_space<vmem>>, vector<1x8x32xf32>,
    %c1_i32 = arith.constant 1 : i32
    %41 = arith.index_cast %c1_i32 : i32 to index
    %c0_14 = arith.constant 0 : index
    %c0_15 = arith.constant 0 : index
    %42 = vector.load %arg2[%41, %c0_14, %c0_15] : memref<8x8x128xf32, #tpu.memory_space<vmem>>, vector<1x8x128xf32>
    %43 = vector.shape_cast %42 : vector<1x8x128xf32> to vector<8x128xf32>
    %44 = arith.truncf %36 : vector<8x32xf32> to vector<8x32xbf16>
    %cst_16 = arith.constant dense<0.000000e+00> : vector<8x128xf32>
    %45 = tpu.matmul %44, %3, %cst_16 {dimension_numbers = #tpu.dot_dimension_numbers<[1], [0], [0], [1], [0, 0, 1, 1], [], []>} : vector<8x32xbf16>, vector<32x128xbf16>, vector<8x128xf32> -> vector<8x128xf32>
    %46 = arith.addf %43, %45 : vector<8x128xf32>
    %47 = vector.extract_strided_slice %46 {offsets = [0, 0], sizes = [8, 32], strides = [1, 1]} : vector<8x128xf32> to vector<8x32xf32>
    %48 = arith.negf %47 : vector<8x32xf32>
    %49 = math.exp %48 : vector<8x32xf32>
    %cst_17 = arith.constant 1.000000e+00 : f32
    %50 = vector.broadcast %cst_17 : f32 to vector<8x32xf32>
    %51 = arith.addf %50, %49 : vector<8x32xf32>
    %52 = arith.divf %50, %51 : vector<8x32xf32>
    %53 = vector.extract_strided_slice %46 {offsets = [0, 32], sizes = [8, 32], strides = [1, 1]} : vector<8x128xf32> to vector<8x32xf32>
    %54 = arith.negf %53 : vector<8x32xf32>
    %55 = math.exp %54 : vector<8x32xf32>
    %cst_18 = arith.constant 1.000000e+00 : f32
    %56 = vector.broadcast %cst_18 : f32 to vector<8x32xf32>
    %57 = arith.addf %56, %55 : vector<8x32xf32>
    %58 = arith.divf %56, %57 : vector<8x32xf32>
    %59 = vector.extract_strided_slice %46 {offsets = [0, 64], sizes = [8, 32], strides = [1, 1]} : vector<8x128xf32> to vector<8x32xf32>
    %60 = math.tanh %59 : vector<8x32xf32>
    %61 = vector.extract_strided_slice %46 {offsets = [0, 96], sizes = [8, 32], strides = [1, 1]} : vector<8x128xf32> to vector<8x32xf32>
    %62 = arith.negf %61 : vector<8x32xf32>
    %63 = math.exp %62 : vector<8x32xf32>
    %cst_19 = arith.constant 1.000000e+00 : f32
    %64 = vector.broadcast %cst_19 : f32 to vector<8x32xf32>
    %65 = arith.addf %64, %63 : vector<8x32xf32>
    %66 = arith.divf %64, %65 : vector<8x32xf32>
    %67 = arith.mulf %58, %34 : vector<8x32xf32>
    %68 = arith.mulf %52, %60 : vector<8x32xf32>
    %69 = arith.addf %67, %68 : vector<8x32xf32>
    %70 = math.tanh %69 : vector<8x32xf32>
    %71 = arith.mulf %66, %70 : vector<8x32xf32>
    %72 = arith.index_cast %c1_i32 : i32 to index
    %c0_20 = arith.constant 0 : index
    %c0_21 = arith.constant 0 : index
    %73 = vector.load %arg4[%72, %c0_20, %c0_21] : memref<8x8x32xf32, #tpu.memory_space<vmem>>, vector<1x8x32xf32>
    %74 = vector.shape_cast %73 : vector<1x8x32xf32> to vector<8x32xf32>
    %75 = vector.shape_cast %71 : vector<8x32xf32> to vector<1x8x32xf32>
    tpu.vector_store %arg4[%72, %c0_20, %c0_21], %75 {strides = array<i32>} : memref<8x8x32xf32, #tpu.memory_space<vmem>>, vector<1x8x32xf32>,
    %c2_i32 = arith.constant 2 : i32
    %76 = arith.index_cast %c2_i32 : i32 to index
    %c0_22 = arith.constant 0 : index
    %c0_23 = arith.constant 0 : index
    %77 = vector.load %arg2[%76, %c0_22, %c0_23] : memref<8x8x128xf32, #tpu.memory_space<vmem>>, vector<1x8x128xf32>
    %78 = vector.shape_cast %77 : vector<1x8x128xf32> to vector<8x128xf32>
    %79 = arith.truncf %71 : vector<8x32xf32> to vector<8x32xbf16>
    %cst_24 = arith.constant dense<0.000000e+00> : vector<8x128xf32>
    %80 = tpu.matmul %79, %3, %cst_24 {dimension_numbers = #tpu.dot_dimension_numbers<[1], [0], [0], [1], [0, 0, 1, 1], [], []>} : vector<8x32xbf16>, vector<32x128xbf16>, vector<8x128xf32> -> vector<8x128xf32>
    %81 = arith.addf %78, %80 : vector<8x128xf32>
    %82 = vector.extract_strided_slice %81 {offsets = [0, 0], sizes = [8, 32], strides = [1, 1]} : vector<8x128xf32> to vector<8x32xf32>
    %83 = arith.negf %82 : vector<8x32xf32>
    %84 = math.exp %83 : vector<8x32xf32>
    %cst_25 = arith.constant 1.000000e+00 : f32
    %85 = vector.broadcast %cst_25 : f32 to vector<8x32xf32>
    %86 = arith.addf %85, %84 : vector<8x32xf32>
    %87 = arith.divf %85, %86 : vector<8x32xf32>
    %88 = vector.extract_strided_slice %81 {offsets = [0, 32], sizes = [8, 32], strides = [1, 1]} : vector<8x128xf32> to vector<8x32xf32>
    %89 = arith.negf %88 : vector<8x32xf32>
    %90 = math.exp %89 : vector<8x32xf32>
    %cst_26 = arith.constant 1.000000e+00 : f32
    %91 = vector.broadcast %cst_26 : f32 to vector<8x32xf32>
    %92 = arith.addf %91, %90 : vector<8x32xf32>
    %93 = arith.divf %91, %92 : vector<8x32xf32>
    %94 = vector.extract_strided_slice %81 {offsets = [0, 64], sizes = [8, 32], strides = [1, 1]} : vector<8x128xf32> to vector<8x32xf32>
    %95 = math.tanh %94 : vector<8x32xf32>
    %96 = vector.extract_strided_slice %81 {offsets = [0, 96], sizes = [8, 32], strides = [1, 1]} : vector<8x128xf32> to vector<8x32xf32>
    %97 = arith.negf %96 : vector<8x32xf32>
    %98 = math.exp %97 : vector<8x32xf32>
    %cst_27 = arith.constant 1.000000e+00 : f32
    %99 = vector.broadcast %cst_27 : f32 to vector<8x32xf32>
    %100 = arith.addf %99, %98 : vector<8x32xf32>
    %101 = arith.divf %99, %100 : vector<8x32xf32>
    %102 = arith.mulf %93, %69 : vector<8x32xf32>
    %103 = arith.mulf %87, %95 : vector<8x32xf32>
    %104 = arith.addf %102, %103 : vector<8x32xf32>
    %105 = math.tanh %104 : vector<8x32xf32>
    %106 = arith.mulf %101, %105 : vector<8x32xf32>
    %107 = arith.index_cast %c2_i32 : i32 to index
    %c0_28 = arith.constant 0 : index
    %c0_29 = arith.constant 0 : index
    %108 = vector.load %arg4[%107, %c0_28, %c0_29] : memref<8x8x32xf32, #tpu.memory_space<vmem>>, vector<1x8x32xf32>
    %109 = vector.shape_cast %108 : vector<1x8x32xf32> to vector<8x32xf32>
    %110 = vector.shape_cast %106 : vector<8x32xf32> to vector<1x8x32xf32>
    tpu.vector_store %arg4[%107, %c0_28, %c0_29], %110 {strides = array<i32>} : memref<8x8x32xf32, #tpu.memory_space<vmem>>, vector<1x8x32xf32>,
    %c3_i32 = arith.constant 3 : i32
    %111 = arith.index_cast %c3_i32 : i32 to index
    %c0_30 = arith.constant 0 : index
    %c0_31 = arith.constant 0 : index
    %112 = vector.load %arg2[%111, %c0_30, %c0_31] : memref<8x8x128xf32, #tpu.memory_space<vmem>>, vector<1x8x128xf32>
    %113 = vector.shape_cast %112 : vector<1x8x128xf32> to vector<8x128xf32>
    %114 = arith.truncf %106 : vector<8x32xf32> to vector<8x32xbf16>
    %cst_32 = arith.constant dense<0.000000e+00> : vector<8x128xf32>
    %115 = tpu.matmul %114, %3, %cst_32 {dimension_numbers = #tpu.dot_dimension_numbers<[1], [0], [0], [1], [0, 0, 1, 1], [], []>} : vector<8x32xbf16>, vector<32x128xbf16>, vector<8x128xf32> -> vector<8x128xf32>
    %116 = arith.addf %113, %115 : vector<8x128xf32>
    %117 = vector.extract_strided_slice %116 {offsets = [0, 0], sizes = [8, 32], strides = [1, 1]} : vector<8x128xf32> to vector<8x32xf32>
    %118 = arith.negf %117 : vector<8x32xf32>
    %119 = math.exp %118 : vector<8x32xf32>
    %cst_33 = arith.constant 1.000000e+00 : f32
    %120 = vector.broadcast %cst_33 : f32 to vector<8x32xf32>
    %121 = arith.addf %120, %119 : vector<8x32xf32>
    %122 = arith.divf %120, %121 : vector<8x32xf32>
    %123 = vector.extract_strided_slice %116 {offsets = [0, 32], sizes = [8, 32], strides = [1, 1]} : vector<8x128xf32> to vector<8x32xf32>
    %124 = arith.negf %123 : vector<8x32xf32>
    %125 = math.exp %124 : vector<8x32xf32>
    %cst_34 = arith.constant 1.000000e+00 : f32
    %126 = vector.broadcast %cst_34 : f32 to vector<8x32xf32>
    %127 = arith.addf %126, %125 : vector<8x32xf32>
    %128 = arith.divf %126, %127 : vector<8x32xf32>
    %129 = vector.extract_strided_slice %116 {offsets = [0, 64], sizes = [8, 32], strides = [1, 1]} : vector<8x128xf32> to vector<8x32xf32>
    %130 = math.tanh %129 : vector<8x32xf32>
    %131 = vector.extract_strided_slice %116 {offsets = [0, 96], sizes = [8, 32], strides = [1, 1]} : vector<8x128xf32> to vector<8x32xf32>
    %132 = arith.negf %131 : vector<8x32xf32>
    %133 = math.exp %132 : vector<8x32xf32>
    %cst_35 = arith.constant 1.000000e+00 : f32
    %134 = vector.broadcast %cst_35 : f32 to vector<8x32xf32>
    %135 = arith.addf %134, %133 : vector<8x32xf32>
    %136 = arith.divf %134, %135 : vector<8x32xf32>
    %137 = arith.mulf %128, %104 : vector<8x32xf32>
    %138 = arith.mulf %122, %130 : vector<8x32xf32>
    %139 = arith.addf %137, %138 : vector<8x32xf32>
    %140 = math.tanh %139 : vector<8x32xf32>
    %141 = arith.mulf %136, %140 : vector<8x32xf32>
    %142 = arith.index_cast %c3_i32 : i32 to index
    %c0_36 = arith.constant 0 : index
    %c0_37 = arith.constant 0 : index
    %143 = vector.load %arg4[%142, %c0_36, %c0_37] : memref<8x8x32xf32, #tpu.memory_space<vmem>>, vector<1x8x32xf32>
    %144 = vector.shape_cast %143 : vector<1x8x32xf32> to vector<8x32xf32>
    %145 = vector.shape_cast %141 : vector<8x32xf32> to vector<1x8x32xf32>
    tpu.vector_store %arg4[%142, %c0_36, %c0_37], %145 {strides = array<i32>} : memref<8x8x32xf32, #tpu.memory_space<vmem>>, vector<1x8x32xf32>,
    %c4_i32 = arith.constant 4 : i32
    %146 = arith.index_cast %c4_i32 : i32 to index
    %c0_38 = arith.constant 0 : index
    %c0_39 = arith.constant 0 : index
    %147 = vector.load %arg2[%146, %c0_38, %c0_39] : memref<8x8x128xf32, #tpu.memory_space<vmem>>, vector<1x8x128xf32>
    %148 = vector.shape_cast %147 : vector<1x8x128xf32> to vector<8x128xf32>
    %149 = arith.truncf %141 : vector<8x32xf32> to vector<8x32xbf16>
    %cst_40 = arith.constant dense<0.000000e+00> : vector<8x128xf32>
    %150 = tpu.matmul %149, %3, %cst_40 {dimension_numbers = #tpu.dot_dimension_numbers<[1], [0], [0], [1], [0, 0, 1, 1], [], []>} : vector<8x32xbf16>, vector<32x128xbf16>, vector<8x128xf32> -> vector<8x128xf32>
    %151 = arith.addf %148, %150 : vector<8x128xf32>
    %152 = vector.extract_strided_slice %151 {offsets = [0, 0], sizes = [8, 32], strides = [1, 1]} : vector<8x128xf32> to vector<8x32xf32>
    %153 = arith.negf %152 : vector<8x32xf32>
    %154 = math.exp %153 : vector<8x32xf32>
    %cst_41 = arith.constant 1.000000e+00 : f32
    %155 = vector.broadcast %cst_41 : f32 to vector<8x32xf32>
    %156 = arith.addf %155, %154 : vector<8x32xf32>
    %157 = arith.divf %155, %156 : vector<8x32xf32>
    %158 = vector.extract_strided_slice %151 {offsets = [0, 32], sizes = [8, 32], strides = [1, 1]} : vector<8x128xf32> to vector<8x32xf32>
    %159 = arith.negf %158 : vector<8x32xf32>
    %160 = math.exp %159 : vector<8x32xf32>
    %cst_42 = arith.constant 1.000000e+00 : f32
    %161 = vector.broadcast %cst_42 : f32 to vector<8x32xf32>
    %162 = arith.addf %161, %160 : vector<8x32xf32>
    %163 = arith.divf %161, %162 : vector<8x32xf32>
    %164 = vector.extract_strided_slice %151 {offsets = [0, 64], sizes = [8, 32], strides = [1, 1]} : vector<8x128xf32> to vector<8x32xf32>
    %165 = math.tanh %164 : vector<8x32xf32>
    %166 = vector.extract_strided_slice %151 {offsets = [0, 96], sizes = [8, 32], strides = [1, 1]} : vector<8x128xf32> to vector<8x32xf32>
    %167 = arith.negf %166 : vector<8x32xf32>
    %168 = math.exp %167 : vector<8x32xf32>
    %cst_43 = arith.constant 1.000000e+00 : f32
    %169 = vector.broadcast %cst_43 : f32 to vector<8x32xf32>
    %170 = arith.addf %169, %168 : vector<8x32xf32>
    %171 = arith.divf %169, %170 : vector<8x32xf32>
    %172 = arith.mulf %163, %139 : vector<8x32xf32>
    %173 = arith.mulf %157, %165 : vector<8x32xf32>
    %174 = arith.addf %172, %173 : vector<8x32xf32>
    %175 = math.tanh %174 : vector<8x32xf32>
    %176 = arith.mulf %171, %175 : vector<8x32xf32>
    %177 = arith.index_cast %c4_i32 : i32 to index
    %c0_44 = arith.constant 0 : index
    %c0_45 = arith.constant 0 : index
    %178 = vector.load %arg4[%177, %c0_44, %c0_45] : memref<8x8x32xf32, #tpu.memory_space<vmem>>, vector<1x8x32xf32>
    %179 = vector.shape_cast %178 : vector<1x8x32xf32> to vector<8x32xf32>
    %180 = vector.shape_cast %176 : vector<8x32xf32> to vector<1x8x32xf32>
    tpu.vector_store %arg4[%177, %c0_44, %c0_45], %180 {strides = array<i32>} : memref<8x8x32xf32, #tpu.memory_space<vmem>>, vector<1x8x32xf32>,
    %c5_i32 = arith.constant 5 : i32
    %181 = arith.index_cast %c5_i32 : i32 to index
    %c0_46 = arith.constant 0 : index
    %c0_47 = arith.constant 0 : index
    %182 = vector.load %arg2[%181, %c0_46, %c0_47] : memref<8x8x128xf32, #tpu.memory_space<vmem>>, vector<1x8x128xf32>
    %183 = vector.shape_cast %182 : vector<1x8x128xf32> to vector<8x128xf32>
    %184 = arith.truncf %176 : vector<8x32xf32> to vector<8x32xbf16>
    %cst_48 = arith.constant dense<0.000000e+00> : vector<8x128xf32>
    %185 = tpu.matmul %184, %3, %cst_48 {dimension_numbers = #tpu.dot_dimension_numbers<[1], [0], [0], [1], [0, 0, 1, 1], [], []>} : vector<8x32xbf16>, vector<32x128xbf16>, vector<8x128xf32> -> vector<8x128xf32>
    %186 = arith.addf %183, %185 : vector<8x128xf32>
    %187 = vector.extract_strided_slice %186 {offsets = [0, 0], sizes = [8, 32], strides = [1, 1]} : vector<8x128xf32> to vector<8x32xf32>
    %188 = arith.negf %187 : vector<8x32xf32>
    %189 = math.exp %188 : vector<8x32xf32>
    %cst_49 = arith.constant 1.000000e+00 : f32
    %190 = vector.broadcast %cst_49 : f32 to vector<8x32xf32>
    %191 = arith.addf %190, %189 : vector<8x32xf32>
    %192 = arith.divf %190, %191 : vector<8x32xf32>
    %193 = vector.extract_strided_slice %186 {offsets = [0, 32], sizes = [8, 32], strides = [1, 1]} : vector<8x128xf32> to vector<8x32xf32>
    %194 = arith.negf %193 : vector<8x32xf32>
    %195 = math.exp %194 : vector<8x32xf32>
    %cst_50 = arith.constant 1.000000e+00 : f32
    %196 = vector.broadcast %cst_50 : f32 to vector<8x32xf32>
    %197 = arith.addf %196, %195 : vector<8x32xf32>
    %198 = arith.divf %196, %197 : vector<8x32xf32>
    %199 = vector.extract_strided_slice %186 {offsets = [0, 64], sizes = [8, 32], strides = [1, 1]} : vector<8x128xf32> to vector<8x32xf32>
    %200 = math.tanh %199 : vector<8x32xf32>
    %201 = vector.extract_strided_slice %186 {offsets = [0, 96], sizes = [8, 32], strides = [1, 1]} : vector<8x128xf32> to vector<8x32xf32>
    %202 = arith.negf %201 : vector<8x32xf32>
    %203 = math.exp %202 : vector<8x32xf32>
    %cst_51 = arith.constant 1.000000e+00 : f32
    %204 = vector.broadcast %cst_51 : f32 to vector<8x32xf32>
    %205 = arith.addf %204, %203 : vector<8x32xf32>
    %206 = arith.divf %204, %205 : vector<8x32xf32>
    %207 = arith.mulf %198, %174 : vector<8x32xf32>
    %208 = arith.mulf %192, %200 : vector<8x32xf32>
    %209 = arith.addf %207, %208 : vector<8x32xf32>
    %210 = math.tanh %209 : vector<8x32xf32>
    %211 = arith.mulf %206, %210 : vector<8x32xf32>
    %212 = arith.index_cast %c5_i32 : i32 to index
    %c0_52 = arith.constant 0 : index
    %c0_53 = arith.constant 0 : index
    %213 = vector.load %arg4[%212, %c0_52, %c0_53] : memref<8x8x32xf32, #tpu.memory_space<vmem>>, vector<1x8x32xf32>
    %214 = vector.shape_cast %213 : vector<1x8x32xf32> to vector<8x32xf32>
    %215 = vector.shape_cast %211 : vector<8x32xf32> to vector<1x8x32xf32>
    tpu.vector_store %arg4[%212, %c0_52, %c0_53], %215 {strides = array<i32>} : memref<8x8x32xf32, #tpu.memory_space<vmem>>, vector<1x8x32xf32>,
    %c6_i32 = arith.constant 6 : i32
    %216 = arith.index_cast %c6_i32 : i32 to index
    %c0_54 = arith.constant 0 : index
    %c0_55 = arith.constant 0 : index
    %217 = vector.load %arg2[%216, %c0_54, %c0_55] : memref<8x8x128xf32, #tpu.memory_space<vmem>>, vector<1x8x128xf32>
    %218 = vector.shape_cast %217 : vector<1x8x128xf32> to vector<8x128xf32>
    %219 = arith.truncf %211 : vector<8x32xf32> to vector<8x32xbf16>
    %cst_56 = arith.constant dense<0.000000e+00> : vector<8x128xf32>
    %220 = tpu.matmul %219, %3, %cst_56 {dimension_numbers = #tpu.dot_dimension_numbers<[1], [0], [0], [1], [0, 0, 1, 1], [], []>} : vector<8x32xbf16>, vector<32x128xbf16>, vector<8x128xf32> -> vector<8x128xf32>
    %221 = arith.addf %218, %220 : vector<8x128xf32>
    %222 = vector.extract_strided_slice %221 {offsets = [0, 0], sizes = [8, 32], strides = [1, 1]} : vector<8x128xf32> to vector<8x32xf32>
    %223 = arith.negf %222 : vector<8x32xf32>
    %224 = math.exp %223 : vector<8x32xf32>
    %cst_57 = arith.constant 1.000000e+00 : f32
    %225 = vector.broadcast %cst_57 : f32 to vector<8x32xf32>
    %226 = arith.addf %225, %224 : vector<8x32xf32>
    %227 = arith.divf %225, %226 : vector<8x32xf32>
    %228 = vector.extract_strided_slice %221 {offsets = [0, 32], sizes = [8, 32], strides = [1, 1]} : vector<8x128xf32> to vector<8x32xf32>
    %229 = arith.negf %228 : vector<8x32xf32>
    %230 = math.exp %229 : vector<8x32xf32>
    %cst_58 = arith.constant 1.000000e+00 : f32
    %231 = vector.broadcast %cst_58 : f32 to vector<8x32xf32>
    %232 = arith.addf %231, %230 : vector<8x32xf32>
    %233 = arith.divf %231, %232 : vector<8x32xf32>
    %234 = vector.extract_strided_slice %221 {offsets = [0, 64], sizes = [8, 32], strides = [1, 1]} : vector<8x128xf32> to vector<8x32xf32>
    %235 = math.tanh %234 : vector<8x32xf32>
    %236 = vector.extract_strided_slice %221 {offsets = [0, 96], sizes = [8, 32], strides = [1, 1]} : vector<8x128xf32> to vector<8x32xf32>
    %237 = arith.negf %236 : vector<8x32xf32>
    %238 = math.exp %237 : vector<8x32xf32>
    %cst_59 = arith.constant 1.000000e+00 : f32
    %239 = vector.broadcast %cst_59 : f32 to vector<8x32xf32>
    %240 = arith.addf %239, %238 : vector<8x32xf32>
    %241 = arith.divf %239, %240 : vector<8x32xf32>
    %242 = arith.mulf %233, %209 : vector<8x32xf32>
    %243 = arith.mulf %227, %235 : vector<8x32xf32>
    %244 = arith.addf %242, %243 : vector<8x32xf32>
    %245 = math.tanh %244 : vector<8x32xf32>
    %246 = arith.mulf %241, %245 : vector<8x32xf32>
    %247 = arith.index_cast %c6_i32 : i32 to index
    %c0_60 = arith.constant 0 : index
    %c0_61 = arith.constant 0 : index
    %248 = vector.load %arg4[%247, %c0_60, %c0_61] : memref<8x8x32xf32, #tpu.memory_space<vmem>>, vector<1x8x32xf32>
    %249 = vector.shape_cast %248 : vector<1x8x32xf32> to vector<8x32xf32>
    %250 = vector.shape_cast %246 : vector<8x32xf32> to vector<1x8x32xf32>
    tpu.vector_store %arg4[%247, %c0_60, %c0_61], %250 {strides = array<i32>} : memref<8x8x32xf32, #tpu.memory_space<vmem>>, vector<1x8x32xf32>,
    %c7_i32 = arith.constant 7 : i32
    %251 = arith.index_cast %c7_i32 : i32 to index
    %c0_62 = arith.constant 0 : index
    %c0_63 = arith.constant 0 : index
    %252 = vector.load %arg2[%251, %c0_62, %c0_63] : memref<8x8x128xf32, #tpu.memory_space<vmem>>, vector<1x8x128xf32>
    %253 = vector.shape_cast %252 : vector<1x8x128xf32> to vector<8x128xf32>
    %254 = arith.truncf %246 : vector<8x32xf32> to vector<8x32xbf16>
    %cst_64 = arith.constant dense<0.000000e+00> : vector<8x128xf32>
    %255 = tpu.matmul %254, %3, %cst_64 {dimension_numbers = #tpu.dot_dimension_numbers<[1], [0], [0], [1], [0, 0, 1, 1], [], []>} : vector<8x32xbf16>, vector<32x128xbf16>, vector<8x128xf32> -> vector<8x128xf32>
    %256 = arith.addf %253, %255 : vector<8x128xf32>
    %257 = vector.extract_strided_slice %256 {offsets = [0, 0], sizes = [8, 32], strides = [1, 1]} : vector<8x128xf32> to vector<8x32xf32>
    %258 = arith.negf %257 : vector<8x32xf32>
    %259 = math.exp %258 : vector<8x32xf32>
    %cst_65 = arith.constant 1.000000e+00 : f32
    %260 = vector.broadcast %cst_65 : f32 to vector<8x32xf32>
    %261 = arith.addf %260, %259 : vector<8x32xf32>
    %262 = arith.divf %260, %261 : vector<8x32xf32>
    %263 = vector.extract_strided_slice %256 {offsets = [0, 32], sizes = [8, 32], strides = [1, 1]} : vector<8x128xf32> to vector<8x32xf32>
    %264 = arith.negf %263 : vector<8x32xf32>
    %265 = math.exp %264 : vector<8x32xf32>
    %cst_66 = arith.constant 1.000000e+00 : f32
    %266 = vector.broadcast %cst_66 : f32 to vector<8x32xf32>
    %267 = arith.addf %266, %265 : vector<8x32xf32>
    %268 = arith.divf %266, %267 : vector<8x32xf32>
    %269 = vector.extract_strided_slice %256 {offsets = [0, 64], sizes = [8, 32], strides = [1, 1]} : vector<8x128xf32> to vector<8x32xf32>
    %270 = math.tanh %269 : vector<8x32xf32>
    %271 = vector.extract_strided_slice %256 {offsets = [0, 96], sizes = [8, 32], strides = [1, 1]} : vector<8x128xf32> to vector<8x32xf32>
    %272 = arith.negf %271 : vector<8x32xf32>
    %273 = math.exp %272 : vector<8x32xf32>
    %cst_67 = arith.constant 1.000000e+00 : f32
    %274 = vector.broadcast %cst_67 : f32 to vector<8x32xf32>
    %275 = arith.addf %274, %273 : vector<8x32xf32>
    %276 = arith.divf %274, %275 : vector<8x32xf32>
    %277 = arith.mulf %268, %244 : vector<8x32xf32>
    %278 = arith.mulf %262, %270 : vector<8x32xf32>
    %279 = arith.addf %277, %278 : vector<8x32xf32>
    %280 = math.tanh %279 : vector<8x32xf32>
    %281 = arith.mulf %276, %280 : vector<8x32xf32>
    %282 = arith.index_cast %c7_i32 : i32 to index
    %c0_68 = arith.constant 0 : index
    %c0_69 = arith.constant 0 : index
    %283 = vector.load %arg4[%282, %c0_68, %c0_69] : memref<8x8x32xf32, #tpu.memory_space<vmem>>, vector<1x8x32xf32>
    %284 = vector.shape_cast %283 : vector<1x8x32xf32> to vector<8x32xf32>
    %285 = vector.shape_cast %281 : vector<8x32xf32> to vector<1x8x32xf32>
    tpu.vector_store %arg4[%282, %c0_68, %c0_69], %285 {strides = array<i32>} : memref<8x8x32xf32, #tpu.memory_space<vmem>>, vector<1x8x32xf32>,
    %c8_i32 = arith.constant 8 : i32
    %c0_70 = arith.constant 0 : index
    %c0_71 = arith.constant 0 : index
    %286 = vector.load %arg8[%c0_70, %c0_71] : memref<8x32xf32, #tpu.memory_space<vmem>>, vector<8x32xf32>
    tpu.vector_store %arg8[%c0_70, %c0_71], %281 {strides = array<i32>} : memref<8x32xf32, #tpu.memory_space<vmem>>, vector<8x32xf32>,
    %c0_72 = arith.constant 0 : index
    %c0_73 = arith.constant 0 : index
    %287 = vector.load %arg9[%c0_72, %c0_73] : memref<8x32xf32, #tpu.memory_space<vmem>>, vector<8x32xf32>
    tpu.vector_store %arg9[%c0_72, %c0_73], %279 {strides = array<i32>} : memref<8x32xf32, #tpu.memory_space<vmem>>, vector<8x32xf32>,
    %c0_i32_74 = arith.constant 0 : i32
    %288 = arith.cmpi eq, %arg1, %c0_i32_74 : i32
    %289 = arith.extui %288 : i1 to i32
    %c0_i32_75 = arith.constant 0 : i32
    %290 = arith.cmpi ne, %289, %c0_i32_75 : i32
    scf.if %290 {
      %c0_76 = arith.constant 0 : index
      %c0_77 = arith.constant 0 : index
      %291 = vector.load %arg5[%c0_76, %c0_77] : memref<8x32xf32, #tpu.memory_space<vmem>>, vector<8x32xf32>
      tpu.vector_store %arg5[%c0_76, %c0_77], %281 {strides = array<i32>} : memref<8x32xf32, #tpu.memory_space<vmem>>, vector<8x32xf32>,
      %c0_78 = arith.constant 0 : index
      %c0_79 = arith.constant 0 : index
      %292 = vector.load %arg6[%c0_78, %c0_79] : memref<8x32xf32, #tpu.memory_space<vmem>>, vector<8x32xf32>
      tpu.vector_store %arg6[%c0_78, %c0_79], %279 {strides = array<i32>} : memref<8x32xf32, #tpu.memory_space<vmem>>, vector<8x32xf32>,
    } else {
    }
    return
  }
  func.func @transform_0(%arg0: i32, %arg1: i32) -> (i32, i32, i32) {
    %c0_i32 = arith.constant 0 : i32
    %c0_i32_0 = arith.constant 0 : i32
    return %arg1, %arg0, %c0_i32 : i32, i32, i32
  }
  func.func @transform_2(%arg0: i32, %arg1: i32) -> (i32, i32, i32) {
    %c0_i32 = arith.constant 0 : i32
    %c0_i32_0 = arith.constant 0 : i32
    return %arg1, %arg0, %c0_i32 : i32, i32, i32
  }
  func.func @transform_3(%arg0: i32, %arg1: i32) -> (i32, i32) {
    %c0_i32 = arith.constant 0 : i32
    %c0_i32_0 = arith.constant 0 : i32
    return %arg0, %c0_i32 : i32, i32
  }
  func.func @transform_4(%arg0: i32, %arg1: i32) -> (i32, i32) {
    %c0_i32 = arith.constant 0 : i32
    %c0_i32_0 = arith.constant 0 : i32
    return %arg0, %c0_i32 : i32, i32
  }
}

</mosaic_0001>

<bundles_post_ra>
// kernel: base_multilayer_rnn_forward.2
= control target key start
LH: loop header
LB: loop body
LE: loop exit
PB: predicated region body
PF: predicated region fallthrough
CT: control target
= control target key end

     0   :  { %10 = vsyncpa [#allocation7], 0  ;;  %s1313_s0 = inlined_call_operand.hbm [shape: f32[8,8,128], index: 0, kind: input, shape index: {}]   ;;  %s1314_s1 = inlined_call_operand.hbm [shape: bf16[32,128], index: 1, kind: input, shape index: {}]   ;;  %s1315_s2 = inlined_call_operand.hbm [shape: f32[8,8,32], index: 2, kind: output, shape index: {0}]   ;;  %s1316_s3 = inlined_call_operand.hbm [shape: f32[8,32], index: 3, kind: output, shape index: {1}]   ;;  %s1317_s4 = inlined_call_operand.hbm [shape: f32[8,32], index: 4, kind: output, shape index: {2}]  }
   0x1   :  { %11 = vsyncpa [#allocation8], 0 }
   0x2   :  { %12 = vsyncpa [#allocation11], 0  ;;  %s1055_s15 = smov [#allocation6]   ;;  %s937_s19 = scalar_lea.hbm %s1313_s0, 1024 }
   0x3   :  { %s18_s16 = sshll.u32 %s1055_s15, 4  ;;  %p938_p0 = scmp.ne.s32.totalorder %s1313_s0, %s937_s19  ;;  %s19_s16 = int_to_ptr.vmem [resolvable:$true] %s18_s16 }
   0x4   :  { %p941_p1 = scmp.lt.u32.totalorder %s937_s19, %s1313_s0 }
   0x6   :  { %p943_p2 = pnand %p941_p1, %p938_p0 }
   0x8   :  { %946 = shalt.err (!%p943_p2)
}
   0x9   :  { %s947_s24 = scalar_lea.vmem %s19_s16, 1024  ;;  %p952_p4 = scmp.lt.s32.totalorder %s19_s16, %s19_s16 }
   0xa   :  { %p948_p3 = scmp.ne.s32.totalorder %s19_s16, %s947_s24  ;;  %p953_p5 = scmp.lt.s32.totalorder %s947_s24, %s947_s24 }
   0xc   :  { %p954_p6 = por %p953_p5, %p952_p4 }
   0xe   :  { %p955_p7 = pnand %p954_p6, %p948_p3 }
  0x10   :  { %958 = shalt.err (!%p955_p7)
}
  0x11   :  { %s1056_s25 = smov 128   ;;  %s1057_s26 = smov 8  }
  0x12   :  { %24 = dma.hbm_to_vmem [thread:$0]  %s1313_s0, 1024, %s19_s16, [#allocation7], %s1056_s25, %s1056_s25, %s1057_s26  }
  0x13   :  { %1047 = dma.done.wait [#allocation7], 1024  }
  0x14   :  { %1048 = vsyncadd [#allocation7], 4294966272  ;;  %s1058_s29 = smov [#allocation2]   ;;  %s959_s7 = scalar_lea.hbm %s1314_s1, 256 }
  0x15   :  { %s40_s30 = sshll.u32 %s1058_s29, 4  ;;  %p960_p8 = scmp.ne.s32.totalorder %s1314_s1, %s959_s7  ;;  %s41_s30 = int_to_ptr.vmem [resolvable:$true] %s40_s30 }
  0x16   :  { %p963_p9 = scmp.lt.u32.totalorder %s959_s7, %s1314_s1 }
  0x18   :  { %p965_p10 = pnand %p963_p9, %p960_p8 }
  0x1a   :  { %968 = shalt.err (!%p965_p10)  }
  0x1b   :  { %s969_s0 = scalar_lea.vmem %s41_s30, 256  ;;  %p974_p12 = scmp.lt.s32.totalorder %s41_s30, %s41_s30 }
  0x1c   :  { %p970_p11 = scmp.ne.s32.totalorder %s41_s30, %s969_s0  ;;  %p975_p13 = scmp.lt.s32.totalorder %s969_s0, %s969_s0 }
  0x1e   :  { %p976_p0 = por %p975_p13, %p974_p12 }
  0x20   :  { %p977_p1 = pnand %p976_p0, %p970_p11 }
  0x22   :  { %980 = shalt.err (!%p977_p1)  }
  0x23   :  { %43 = dma.hbm_to_vmem [thread:$0]  %s1314_s1, 256, %s41_s30, [#allocation5] }
  0x24   :  { %1049 = dma.done.wait [#allocation5], 256 }
  0x25   :  { %1050 = vsyncadd [#allocation5], 4294967040  ;;  %vm48_vm0 = vcmask 261120   ;;  %v1059_v0 = vmov 0.0   ;;  %vm1060_vm1 = vmmov 0   ;;  %v1129_v1 = vld [vmem:[#allocation2] sm:$0xff] }
  0x26   :  { %797 = vmatprep.subr.bf16.mxu0 %v1059_v0  ;;  %801 = vmatprep.mubr.msk.bf16.mxu0 %vm1060_vm1, %v1059_v0  ;;  %49 = vst.msk [vmem:[#allocation3] sm:$0xff] %vm48_vm0, %v1059_v0  ;;  %50 = vst.msk [vmem:[#allocation4] sm:$0xff] %vm48_vm0, %v1059_v0  ;;  %v1134_v3 = vld [vmem:[#allocation2 + $0x8] sm:$0xff]  ;;  %v55_v5 = vld [vmem:[#allocation6] sm:$0xff]  ;;  %s1061_s1 = smov 64   ;;  %s1062_s14 = smov 32  }
  0x27   :  { %805 = vmatprep.subr.bf16.mxu1 %v1059_v0  ;;  %809 = vmatprep.mubr.msk.bf16.mxu1 %vm1060_vm1, %v1059_v0  ;;  %v136_v28 = vld [vmem:[#allocation6 + $0x8] sm:$0xff]  ;;  %v216_v49 = vld [vmem:[#allocation6 + $0x10] sm:$0xff]  ;;  %s1063_s15 = smov 96   ;;  %s1064_s16 = smov [#allocation10]  }
  0x28   :  { %798 = vmatpush3.bf16.msra.mxu0 %v1129_v1  ;;  %806 = vmatpush3.bf16.msra.mxu1 %v1129_v1  ;;  %s724_s17 = sshll.u32 %s1064_s16, 4  ;;  %s1065_s18 = smov [#allocation9]   ;;  %s725_s17 = int_to_ptr.vmem [resolvable:$true] %s724_s17 }
  0x29   :  { %799 = vmatprep.subr.bf16.mxu0 %v1059_v0  ;;  %807 = vmatprep.subr.bf16.mxu1 %v1059_v0  ;;  %s711_s19 = sshll.u32 %s1065_s18, 4  ;;  %s1066_s20 = smov [#allocation12]   ;;  %s1255_s19 = int_to_ptr.vmem [resolvable:$true] %s711_s19 }
  0x2a   :  { %s734_s21 = sshll.u32 %s1066_s20, 4  ;;  %s981_s22 = scalar_lea.vmem %s725_s17, 128  ;;  %s1260_s21 = int_to_ptr.vmem [resolvable:$true] %s734_s21 }
  0x2b   :  { %p982_p2 = scmp.ne.s32.totalorder %s725_s17, %s981_s22  ;;  %p986_p3 = scmp.lt.s32.totalorder %s725_s17, %s725_s17 }
  0x2c   :  { %800 = vmatpush3.bf16.msra.mxu0 %v1134_v3  ;;  %808 = vmatpush3.bf16.msra.mxu1 %v1134_v3  ;;  %p987_p4 = scmp.lt.s32.totalorder %s981_s22, %s981_s22 }
  0x2d   :  { %v53_v2 = vld [vmem:[#allocation3] sm:$0xff]  ;;  %813 = vmatprep.subr.bf16.mxu0 %v1059_v0  ;;  %821 = vmatprep.subr.bf16.mxu1 %v1059_v0  ;;  %v54_v12 = vld [vmem:[#allocation4] sm:$0xff] }
  0x2e   :  { %v56_v4 = vpack.c.bf16 %v53_v2, %v53_v2  ;;  %p988_p5 = por %p987_p4, %p986_p3 }
  0x30   :  { %802 = vmatmul.mubr.msk.bf16.vlgmr.msra.gmra.mrb[0].mxu0 %vm48_vm0, %v56_v4  ;;  %p989_p6 = pnand %p988_p5, %p982_p2 }
  0x31   :  { %814 = vmatpush3.bf16.msra.mxu0 %v1129_v1  ;;  %817 = vmatprep.mubr.msk.bf16.mxu0 %vm1060_vm1, %v1059_v0 }
  0x32   :  { %815 = vmatprep.subr.bf16.mxu0 %v1059_v0 }
  0x35   :  { %816 = vmatpush3.bf16.msra.mxu0 %v1134_v3 }
  0x36   :  { %829 = vmatprep.subr.bf16.mxu0 %v1059_v0 }
 0x103   :  { %v95_v6 = vpop.f32.mrb[0].mxu0 }
 0x104   :  { %v101_v7 = vadd.f32 %v95_v6, %v55_v5  ;;  %v803_v8 = vpop.f32.mrb[1].mxu0 }
 0x105   :  { %v98_v9 = vpop.f32.mrb[2].mxu0 }
 0x106   :  { %873 = vtanh.f32 %v101_v7  ;;  %v804_v10 = vpop.f32.mrb[3].mxu0  ;;  %v757_v13 = vmul.f32 -1.442695, %v101_v7  ;;  %v296_v9 = vld [vmem:[#allocation6 + $0x18] sm:$0xff] }
 0x108   :  { %875 = vpow2.f32 %v757_v13 }
 0x110   :  { %v874_v11 = vpop.eup %873 }
 0x111   :  { %115 = vrot.lane.b32.xlu0 %v874_v11, %s1061_s1 }
 0x112   :  { %v876_v14 = vpop.eup %875 }
 0x113   :  { %v105_v15 = vadd.f32 1.0, %v876_v14 }
 0x115   :  { %110 = vrot.lane.b32.xlu0 %v54_v12, %s1062_s14  ;;  %877 = vrcp.f32 %v105_v15 }
 0x11f   :  { %v878_v16 = vpop.eup %877 }
 0x183   :  { %v116_v17 = vpop.permute.xlu0 %115 }
 0x184   :  { %v118_v18 = vmul.f32 %v878_v16, %v116_v17 }
 0x186   :  { %120 = vrot.lane.b32.xlu1 %v118_v18, %s1062_s14 }
 0x187   :  { %v111_v19 = vpop.permute.xlu0 %110 }
 0x188   :  { %v113_v20 = vmul.f32 %v878_v16, %v111_v19 }
 0x1f8   :  { %v121_v21 = vpop.permute.xlu1 %120 }
 0x1f9   :  { %v123_v22 = vadd.f32 %v121_v21, %v113_v20 }
 0x1fb   :  { %879 = vtanh.f32 %v123_v22 }
 0x205   :  { %v880_v23 = vpop.eup %879 }
 0x206   :  { %126 = vrot.lane.b32.xlu1 %v880_v23, %s1061_s1 }
 0x278   :  { %v127_v24 = vpop.permute.xlu1 %126 }
 0x279   :  { %v1152_v25 = vmul.f32 %v878_v16, %v127_v24 }
 0x27b   :  { %v137_v26 = vpack.c.bf16 %v1152_v25, %v1152_v25 }
 0x27d   :  { %139 = vrot.lane.b32.xlu0 %v137_v26, %s1062_s14 }
 0x2ef   :  { %v140_v27 = vpop.permute.xlu0 %139 }
 0x2f0   :  { %810 = vmatmul.mubr.msk.bf16.vlgmr.msra.gmra.mrb[0].mxu1 %vm48_vm0, %v140_v27 }
 0x2f1   :  { %822 = vmatpush3.bf16.msra.mxu1 %v1129_v1  ;;  %825 = vmatprep.mubr.msk.bf16.mxu1 %vm1060_vm1, %v1059_v0 }
 0x2f2   :  { %823 = vmatprep.subr.bf16.mxu1 %v1059_v0 }
 0x2f5   :  { %824 = vmatpush3.bf16.msra.mxu1 %v1134_v3 }
 0x2f6   :  { %837 = vmatprep.subr.bf16.mxu1 %v1059_v0 }
 0x3c3   :  { %v178_v29 = vpop.f32.mrb[0].mxu1 }
 0x3c4   :  { %v184_v30 = vadd.f32 %v178_v29, %v136_v28  ;;  %v811_v31 = vpop.f32.mrb[1].mxu1 }
 0x3c5   :  { %v181_v32 = vpop.f32.mrb[2].mxu1  ;;  %v376_v31 = vld [vmem:[#allocation6 + $0x20] sm:$0xff] }
 0x3c6   :  { %881 = vtanh.f32 %v184_v30  ;;  %v812_v33 = vpop.f32.mrb[3].mxu1  ;;  %v759_v35 = vmul.f32 -1.442695, %v184_v30 }
 0x3c8   :  { %883 = vpow2.f32 %v759_v35 }
 0x3d0   :  { %v882_v34 = vpop.eup %881 }
 0x3d1   :  { %194 = vrot.lane.b32.xlu1 %v882_v34, %s1061_s1 }
 0x3d2   :  { %v884_v36 = vpop.eup %883 }
 0x3d3   :  { %v188_v37 = vadd.f32 1.0, %v884_v36 }
 0x3d5   :  { %885 = vrcp.f32 %v188_v37 }
 0x3df   :  { %v886_v38 = vpop.eup %885 }
 0x3e0   :  { %v192_v41 = vmul.f32 %v886_v38, %v123_v22 }
 0x443   :  { %v195_v39 = vpop.permute.xlu1 %194 }
 0x444   :  { %v197_v40 = vmul.f32 %v886_v38, %v195_v39 }
 0x446   :  { %199 = vrot.lane.b32.xlu0 %v197_v40, %s1062_s14 }
 0x4b8   :  { %v200_v42 = vpop.permute.xlu0 %199 }
 0x4b9   :  { %v202_v43 = vadd.f32 %v200_v42, %v192_v41 }
 0x4bb   :  { %887 = vtanh.f32 %v202_v43 }
 0x4c5   :  { %v888_v44 = vpop.eup %887 }
 0x4c6   :  { %205 = vrot.lane.b32.xlu1 %v888_v44, %s1061_s1 }
 0x538   :  { %v206_v45 = vpop.permute.xlu1 %205 }
 0x539   :  { %v1167_v46 = vmul.f32 %v886_v38, %v206_v45 }
 0x53b   :  { %v217_v47 = vpack.c.bf16 %v1167_v46, %v1167_v46 }
 0x53d   :  { %219 = vrot.lane.b32.xlu0 %v217_v47, %s1062_s14 }
 0x5af   :  { %v220_v48 = vpop.permute.xlu0 %219 }
 0x5b0   :  { %818 = vmatmul.mubr.msk.bf16.vlgmr.msra.gmra.mrb[4].mxu0 %vm48_vm0, %v220_v48 }
 0x5b1   :  { %830 = vmatpush3.bf16.msra.mxu0 %v1129_v1  ;;  %833 = vmatprep.mubr.msk.bf16.mxu0 %vm1060_vm1, %v1059_v0 }
 0x5b2   :  { %831 = vmatprep.subr.bf16.mxu0 %v1059_v0 }
 0x5b5   :  { %832 = vmatpush3.bf16.msra.mxu0 %v1134_v3 }
 0x5b6   :  { %845 = vmatprep.subr.bf16.mxu0 %v1059_v0 }
 0x683   :  { %v258_v50 = vpop.f32.mrb[4].mxu0 }
 0x684   :  { %v264_v51 = vadd.f32 %v258_v50, %v216_v49  ;;  %v819_v52 = vpop.f32.mrb[5].mxu0 }
 0x685   :  { %v261_v53 = vpop.f32.mrb[6].mxu0 }
 0x686   :  { %889 = vtanh.f32 %v264_v51  ;;  %v820_v54 = vpop.f32.mrb[7].mxu0  ;;  %v761_v56 = vmul.f32 -1.442695, %v264_v51  ;;  %v456_v53 = vld [vmem:[#allocation6 + $0x28] sm:$0xff] }
 0x688   :  { %891 = vpow2.f32 %v761_v56 }
 0x690   :  { %v890_v55 = vpop.eup %889 }
 0x691   :  { %274 = vrot.lane.b32.xlu1 %v890_v55, %s1061_s1 }
 0x692   :  { %v892_v57 = vpop.eup %891 }
 0x693   :  { %v268_v58 = vadd.f32 1.0, %v892_v57 }
 0x695   :  { %893 = vrcp.f32 %v268_v58 }
 0x69f   :  { %v894_v59 = vpop.eup %893 }
 0x6a0   :  { %v272_v62 = vmul.f32 %v894_v59, %v202_v43 }
 0x703   :  { %v275_v60 = vpop.permute.xlu1 %274 }
 0x704   :  { %v277_v61 = vmul.f32 %v894_v59, %v275_v60 }
 0x706   :  { %279 = vrot.lane.b32.xlu0 %v277_v61, %s1062_s14 }
 0x778   :  { %v280_v63 = vpop.permute.xlu0 %279 }
 0x779   :  { %v282_v2 = vadd.f32 %v280_v63, %v272_v62 }
 0x77b   :  { %895 = vtanh.f32 %v282_v2 }
 0x785   :  { %v896_v4 = vpop.eup %895 }
 0x786   :  { %285 = vrot.lane.b32.xlu1 %v896_v4, %s1061_s1 }
 0x7f8   :  { %v286_v5 = vpop.permute.xlu1 %285 }
 0x7f9   :  { %v1182_v6 = vmul.f32 %v894_v59, %v286_v5 }
 0x7fb   :  { %v297_v7 = vpack.c.bf16 %v1182_v6, %v1182_v6 }
 0x7fd   :  { %299 = vrot.lane.b32.xlu0 %v297_v7, %s1062_s14 }
 0x86f   :  { %v300_v8 = vpop.permute.xlu0 %299 }
 0x870   :  { %826 = vmatmul.mubr.msk.bf16.vlgmr.msra.gmra.mrb[4].mxu1 %vm48_vm0, %v300_v8 }
 0x871   :  { %838 = vmatpush3.bf16.msra.mxu1 %v1129_v1  ;;  %841 = vmatprep.mubr.msk.bf16.mxu1 %vm1060_vm1, %v1059_v0 }
 0x872   :  { %839 = vmatprep.subr.bf16.mxu1 %v1059_v0 }
 0x875   :  { %840 = vmatpush3.bf16.msra.mxu1 %v1134_v3 }
 0x876   :  { %853 = vmatprep.subr.bf16.mxu1 %v1059_v0 }
 0x943   :  { %v338_v10 = vpop.f32.mrb[4].mxu1 }
 0x944   :  { %v344_v11 = vadd.f32 %v338_v10, %v296_v9  ;;  %v827_v12 = vpop.f32.mrb[5].mxu1 }
 0x945   :  { %v341_v13 = vpop.f32.mrb[6].mxu1 }
 0x946   :  { %897 = vtanh.f32 %v344_v11  ;;  %v828_v14 = vpop.f32.mrb[7].mxu1  ;;  %v763_v16 = vmul.f32 -1.442695, %v344_v11  ;;  %v536_v11 = vld [vmem:[#allocation6 + $0x30] sm:$0xff] }
 0x948   :  { %899 = vpow2.f32 %v763_v16 }
 0x950   :  { %v898_v15 = vpop.eup %897 }
 0x951   :  { %354 = vrot.lane.b32.xlu1 %v898_v15, %s1061_s1 }
 0x952   :  { %v900_v17 = vpop.eup %899 }
 0x953   :  { %v348_v18 = vadd.f32 1.0, %v900_v17 }
 0x955   :  { %901 = vrcp.f32 %v348_v18 }
 0x95f   :  { %v902_v19 = vpop.eup %901 }
 0x960   :  { %v352_v22 = vmul.f32 %v902_v19, %v282_v2 }
 0x9c3   :  { %v355_v20 = vpop.permute.xlu1 %354 }
 0x9c4   :  { %v357_v21 = vmul.f32 %v902_v19, %v355_v20 }
 0x9c6   :  { %359 = vrot.lane.b32.xlu0 %v357_v21, %s1062_s14 }
 0xa38   :  { %v360_v23 = vpop.permute.xlu0 %359 }
 0xa39   :  { %v362_v24 = vadd.f32 %v360_v23, %v352_v22 }
 0xa3b   :  { %903 = vtanh.f32 %v362_v24 }
 0xa45   :  { %v904_v26 = vpop.eup %903 }
 0xa46   :  { %365 = vrot.lane.b32.xlu1 %v904_v26, %s1061_s1 }
 0xab8   :  { %v366_v27 = vpop.permute.xlu1 %365 }
 0xab9   :  { %v1197_v28 = vmul.f32 %v902_v19, %v366_v27 }
 0xabb   :  { %v377_v29 = vpack.c.bf16 %v1197_v28, %v1197_v28 }
 0xabd   :  { %379 = vrot.lane.b32.xlu0 %v377_v29, %s1062_s14 }
 0xb2f   :  { %v380_v30 = vpop.permute.xlu0 %379 }
 0xb30   :  { %834 = vmatmul.mubr.msk.bf16.vlgmr.msra.gmra.mrb[8].mxu0 %vm48_vm0, %v380_v30 }
 0xb31   :  { %846 = vmatpush3.bf16.msra.mxu0 %v1129_v1  ;;  %849 = vmatprep.mubr.msk.bf16.mxu0 %vm1060_vm1, %v1059_v0 }
 0xb32   :  { %847 = vmatprep.subr.bf16.mxu0 %v1059_v0 }
 0xb35   :  { %848 = vmatpush3.bf16.msra.mxu0 %v1134_v3 }
 0xc03   :  { %v418_v32 = vpop.f32.mrb[8].mxu0 }
 0xc04   :  { %v424_v33 = vadd.f32 %v418_v32, %v376_v31  ;;  %v835_v34 = vpop.f32.mrb[9].mxu0 }
 0xc05   :  { %v421_v35 = vpop.f32.mrb[10].mxu0  ;;  %v616_v34 = vld [vmem:[#allocation6 + $0x38] sm:$0xff] }
 0xc06   :  { %905 = vtanh.f32 %v424_v33  ;;  %v836_v36 = vpop.f32.mrb[11].mxu0  ;;  %v765_v38 = vmul.f32 -1.442695, %v424_v33 }
 0xc08   :  { %907 = vpow2.f32 %v765_v38 }
 0xc10   :  { %v906_v37 = vpop.eup %905 }
 0xc11   :  { %434 = vrot.lane.b32.xlu1 %v906_v37, %s1061_s1 }
 0xc12   :  { %v908_v39 = vpop.eup %907 }
 0xc13   :  { %v428_v40 = vadd.f32 1.0, %v908_v39 }
 0xc15   :  { %909 = vrcp.f32 %v428_v40 }
 0xc1f   :  { %v910_v41 = vpop.eup %909 }
 0xc20   :  { %v432_v44 = vmul.f32 %v910_v41, %v362_v24 }
 0xc83   :  { %v435_v42 = vpop.permute.xlu1 %434 }
 0xc84   :  { %v437_v43 = vmul.f32 %v910_v41, %v435_v42 }
 0xc86   :  { %439 = vrot.lane.b32.xlu0 %v437_v43, %s1062_s14 }
 0xcf8   :  { %v440_v45 = vpop.permute.xlu0 %439 }
 0xcf9   :  { %v442_v47 = vadd.f32 %v440_v45, %v432_v44 }
 0xcfb   :  { %911 = vtanh.f32 %v442_v47 }
 0xd05   :  { %v912_v48 = vpop.eup %911 }
 0xd06   :  { %445 = vrot.lane.b32.xlu1 %v912_v48, %s1061_s1 }
 0xd78   :  { %v446_v49 = vpop.permute.xlu1 %445 }
 0xd79   :  { %v1211_v50 = vmul.f32 %v910_v41, %v446_v49 }
 0xd7b   :  { %v457_v51 = vpack.c.bf16 %v1211_v50, %v1211_v50 }
 0xd7d   :  { %459 = vrot.lane.b32.xlu0 %v457_v51, %s1062_s14 }
 0xdef   :  { %v460_v52 = vpop.permute.xlu0 %459 }
 0xdf0   :  { %842 = vmatmul.mubr.msk.bf16.vlgmr.msra.gmra.mrb[8].mxu1 %vm48_vm0, %v460_v52 }
 0xdf1   :  { %854 = vmatpush3.bf16.msra.mxu1 %v1129_v1  ;;  %857 = vmatprep.mubr.msk.bf16.mxu1 %vm1060_vm1, %v1059_v0 }
 0xdf2   :  { %855 = vmatprep.subr.bf16.mxu1 %v1059_v0 }
 0xdf5   :  { %856 = vmatpush3.bf16.msra.mxu1 %v1134_v3 }
 0xec3   :  { %v498_v54 = vpop.f32.mrb[8].mxu1 }
 0xec4   :  { %v504_v55 = vadd.f32 %v498_v54, %v456_v53  ;;  %v843_v56 = vpop.f32.mrb[9].mxu1 }
 0xec5   :  { %v501_v57 = vpop.f32.mrb[10].mxu1 }
 0xec6   :  { %913 = vtanh.f32 %v504_v55  ;;  %v844_v58 = vpop.f32.mrb[11].mxu1  ;;  %v767_v60 = vmul.f32 -1.442695, %v504_v55 }
 0xec8   :  { %915 = vpow2.f32 %v767_v60 }
 0xed0   :  { %v914_v59 = vpop.eup %913 }
 0xed1   :  { %514 = vrot.lane.b32.xlu1 %v914_v59, %s1061_s1 }
 0xed2   :  { %v916_v1 = vpop.eup %915 }
 0xed3   :  { %v508_v61 = vadd.f32 1.0, %v916_v1 }
 0xed5   :  { %917 = vrcp.f32 %v508_v61 }
 0xedf   :  { %v918_v62 = vpop.eup %917 }
 0xee0   :  { %v512_v3 = vmul.f32 %v918_v62, %v442_v47 }
 0xf43   :  { %v515_v63 = vpop.permute.xlu1 %514 }
 0xf44   :  { %v517_v0 = vmul.f32 %v918_v62, %v515_v63 }
 0xf46   :  { %519 = vrot.lane.b32.xlu0 %v517_v0, %s1062_s14 }
 0xfb8   :  { %v520_v2 = vpop.permute.xlu0 %519 }
 0xfb9   :  { %v522_v4 = vadd.f32 %v520_v2, %v512_v3 }
 0xfbb   :  { %919 = vtanh.f32 %v522_v4 }
 0xfc5   :  { %v920_v5 = vpop.eup %919 }
 0xfc6   :  { %525 = vrot.lane.b32.xlu1 %v920_v5, %s1061_s1 }
0x1038   :  { %v526_v7 = vpop.permute.xlu1 %525 }
0x1039   :  { %v528_v8 = vmul.f32 %v918_v62, %v526_v7 }
0x103b   :  { %v537_v9 = vpack.c.bf16 %v528_v8, %v528_v8 }
0x103d   :  { %539 = vrot.lane.b32.xlu0 %v537_v9, %s1062_s14 }
0x10af   :  { %v540_v10 = vpop.permute.xlu0 %539 }
0x10b0   :  { %850 = vmatmul.mubr.msk.bf16.vlgmr.msra.gmra.mrb[12].mxu0 %vm48_vm0, %v540_v10 }
0x1183   :  { %v578_v12 = vpop.f32.mrb[12].mxu0 }
0x1184   :  { %v584_v13 = vadd.f32 %v578_v12, %v536_v11  ;;  %v851_v14 = vpop.f32.mrb[13].mxu0 }
0x1185   :  { %v581_v15 = vpop.f32.mrb[14].mxu0 }
0x1186   :  { %921 = vtanh.f32 %v584_v13  ;;  %v852_v16 = vpop.f32.mrb[15].mxu0  ;;  %v769_v18 = vmul.f32 -1.442695, %v584_v13 }
0x1188   :  { %923 = vpow2.f32 %v769_v18 }
0x1190   :  { %v922_v17 = vpop.eup %921 }
0x1191   :  { %594 = vrot.lane.b32.xlu1 %v922_v17, %s1061_s1 }
0x1192   :  { %v924_v19 = vpop.eup %923 }
0x1193   :  { %v588_v20 = vadd.f32 1.0, %v924_v19 }
0x1195   :  { %925 = vrcp.f32 %v588_v20 }
0x119f   :  { %v926_v21 = vpop.eup %925 }
0x11a0   :  { %v592_v24 = vmul.f32 %v926_v21, %v522_v4 }
0x1203   :  { %v595_v22 = vpop.permute.xlu1 %594 }
0x1204   :  { %v597_v23 = vmul.f32 %v926_v21, %v595_v22 }
0x1206   :  { %599 = vrot.lane.b32.xlu0 %v597_v23, %s1062_s14 }
0x1278   :  { %v600_v26 = vpop.permute.xlu0 %599 }
0x1279   :  { %v602_v27 = vadd.f32 %v600_v26, %v592_v24 }
0x127b   :  { %927 = vtanh.f32 %v602_v27 }
0x1285   :  { %v928_v29 = vpop.eup %927 }
0x1286   :  { %605 = vrot.lane.b32.xlu1 %v928_v29, %s1061_s1 }
0x12f8   :  { %v606_v30 = vpop.permute.xlu1 %605 }
0x12f9   :  { %v608_v31 = vmul.f32 %v926_v21, %v606_v30 }
0x12fb   :  { %v617_v32 = vpack.c.bf16 %v608_v31, %v608_v31 }
0x12fd   :  { %619 = vrot.lane.b32.xlu0 %v617_v32, %s1062_s14 }
0x136f   :  { %v620_v33 = vpop.permute.xlu0 %619 }
0x1370   :  { %858 = vmatmul.mubr.msk.bf16.vlgmr.msra.gmra.mrb[12].mxu1 %vm48_vm0, %v620_v33 }
0x1443   :  { %v658_v35 = vpop.f32.mrb[12].mxu1 }
0x1444   :  { %v664_v36 = vadd.f32 %v658_v35, %v616_v34  ;;  %v859_v37 = vpop.f32.mrb[13].mxu1 }
0x1445   :  { %v661_v38 = vpop.f32.mrb[14].mxu1 }
0x1446   :  { %929 = vtanh.f32 %v664_v36  ;;  %v860_v39 = vpop.f32.mrb[15].mxu1  ;;  %v771_v41 = vmul.f32 -1.442695, %v664_v36 }
0x1448   :  { %931 = vpow2.f32 %v771_v41 }
0x1450   :  { %v930_v40 = vpop.eup %929 }
0x1451   :  { %674 = vrot.lane.b32.xlu1 %v930_v40, %s1061_s1 }
0x1452   :  { %v932_v42 = vpop.eup %931 }
0x1453   :  { %v668_v43 = vadd.f32 1.0, %v932_v42 }
0x1455   :  { %933 = vrcp.f32 %v668_v43 }
0x145f   :  { %v934_v44 = vpop.eup %933 }
0x1460   :  { %v672_v48 = vmul.f32 %v934_v44, %v602_v27 }
0x14c3   :  { %v675_v45 = vpop.permute.xlu1 %674 }
0x14c4   :  { %v677_v47 = vmul.f32 %v934_v44, %v675_v45 }
0x14c6   :  { %679 = vrot.lane.b32.xlu0 %v677_v47, %s1062_s14 }
0x14ca   :  { %210 = vrot.lane.b32.xlu0 %v1167_v46, %s1062_s14 }
0x14ce   :  { %370 = vrot.lane.b32.xlu0 %v1197_v28, %s1062_s14 }
0x14d2   :  { %530 = vrot.lane.b32.xlu0 %v528_v8, %s1062_s14 }
0x1538   :  { %v680_v49 = vpop.permute.xlu0 %679 }
0x1539   :  { %v682_v51 = vadd.f32 %v680_v49, %v672_v48 }
0x153b   :  { %935 = vtanh.f32 %v682_v51 }
0x153c   :  { %v211_v52 = vpop.permute.xlu0 %210 }
0x153d   :  { %214 = vst.msk [vmem:[#allocation9 + $0x8] sm:$0xff] %vm48_vm0, %v211_v52 }
0x1540   :  { %v371_v53 = vpop.permute.xlu0 %370 }
0x1541   :  { %374 = vst.msk [vmem:[#allocation9 + $0x18] sm:$0xff] %vm48_vm0, %v371_v53 }
0x1544   :  { %v531_v54 = vpop.permute.xlu0 %530 }
0x1545   :  { %v936_v55 = vpop.eup %935  ;;  %534 = vst.msk [vmem:[#allocation9 + $0x28] sm:$0xff] %vm48_vm0, %v531_v54 }
0x1546   :  { %685 = vrot.lane.b32.xlu1 %v936_v55, %s1061_s1 }
0x154a   :  { %131 = vrot.lane.b32.xlu1 %v1152_v25, %s1062_s14 }
0x154e   :  { %290 = vrot.lane.b32.xlu1 %v1182_v6, %s1062_s14 }
0x1552   :  { %450 = vrot.lane.b32.xlu1 %v1211_v50, %s1062_s14 }
0x1556   :  { %610 = vrot.lane.b32.xlu1 %v608_v31, %s1062_s14 }
0x15b8   :  { %v686_v46 = vpop.permute.xlu1 %685 }
0x15b9   :  { %v688_v28 = vmul.f32 %v934_v44, %v686_v46 }
0x15bb   :  { %690 = vrot.lane.b32.xlu0 %v688_v28, %s1062_s14 }
0x15bc   :  { %v132_v56 = vpop.permute.xlu1 %131 }
0x15bd   :  { %134 = vst.msk [vmem:[#allocation9] sm:$0xff] %vm48_vm0, %v132_v56 }
0x15bf   :  { %697 = vrot.lane.b32.xlu0 %v682_v51, %s1063_s15 }
0x15c0   :  { %v291_v57 = vpop.permute.xlu1 %290 }
0x15c1   :  { %294 = vst.msk [vmem:[#allocation9 + $0x10] sm:$0xff] %vm48_vm0, %v291_v57 }
0x15c4   :  { %v451_v25 = vpop.permute.xlu1 %450 }
0x15c5   :  { %454 = vst.msk [vmem:[#allocation9 + $0x20] sm:$0xff] %vm48_vm0, %v451_v25 }
0x15c8   :  { %v611_v6 = vpop.permute.xlu1 %610 }
0x15c9   :  { %614 = vst.msk [vmem:[#allocation9 + $0x30] sm:$0xff] %vm48_vm0, %v611_v6 }
0x162d   :  { %v691_v50 = vpop.permute.xlu0 %690 }
0x162e   :  { %694 = vst.msk [vmem:[#allocation9 + $0x38] sm:$0xff] %vm48_vm0, %v691_v50  ;;  %695 = vst.msk [vmem:[#allocation3] sm:$0xff] %vm48_vm0, %v691_v50 }
0x162f   :  { %704 = vst.msk [vmem:[#allocation10] sm:$0xff] %vm48_vm0, %v691_v50 }
0x1630   :  { %992 = shalt.err (!%p989_p6)
}
0x1631   :  { %s993_s27 = scalar_lea.hbm %s1316_s3, 128 }
0x1632   :  { %p994_p7 = scmp.ne.s32.totalorder %s1316_s3, %s993_s27  ;;  %p997_p8 = scmp.lt.u32.totalorder %s993_s27, %s1316_s3 }
0x1634   :  { %p999_p9 = pnand %p997_p8, %p994_p7 }
0x1636   :  { %1002 = shalt.err (!%p999_p9)
}
0x1637   :  { %727 = dma.vmem_to_hbm [thread:$0]  %s725_s17, 128, %s1316_s3, [#allocation11]  }
0x1638   :  { %s1003_s8 = scalar_lea.vmem %s1255_s19, 1024  ;;  %p1008_p11 = scmp.lt.s32.totalorder %s1255_s19, %s1255_s19 }
0x1639   :  { %p1004_p10 = scmp.ne.s32.totalorder %s1255_s19, %s1003_s8  ;;  %p1009_p12 = scmp.lt.s32.totalorder %s1003_s8, %s1003_s8 }
0x163b   :  { %p1010_p13 = por %p1009_p12, %p1008_p11 }
0x163d   :  { %p1011_p0 = pnand %p1010_p13, %p1004_p10 }
0x163f   :  { %1014 = shalt.err (!%p1011_p0)
}
0x1640   :  { %s1015_s11 = scalar_lea.hbm %s1315_s2, 1024 }
0x1641   :  { %p1016_p1 = scmp.ne.s32.totalorder %s1315_s2, %s1015_s11  ;;  %p1019_p2 = scmp.lt.u32.totalorder %s1015_s11, %s1315_s2 }
0x1643   :  { %p1021_p3 = pnand %p1019_p2, %p1016_p1 }
0x1645   :  { %1024 = shalt.err (!%p1021_p3)
}
0x1646   :  { %717 = dma.vmem_to_hbm [thread:$0]  %s1255_s19, 1024, %s1315_s2, [#allocation8], %s1056_s25, %s1056_s25, %s1057_s26   ;;  %v698_v58 = vpop.permute.xlu0 %697 }
0x1647   :  { %700 = vst.msk [vmem:[#allocation4] sm:$0xff] %vm48_vm0, %v698_v58  ;;  %705 = vst.msk [vmem:[#allocation12] sm:$0xff] %vm48_vm0, %v698_v58  ;;  %s1025_s15 = scalar_lea.vmem %s1260_s21, 128  ;;  %p1030_p5 = scmp.lt.s32.totalorder %s1260_s21, %s1260_s21 }
0x1648   :  { %p1026_p4 = scmp.ne.s32.totalorder %s1260_s21, %s1025_s15  ;;  %p1031_p6 = scmp.lt.s32.totalorder %s1025_s15, %s1025_s15 }
0x164a   :  { %p1032_p7 = por %p1031_p6, %p1030_p5 }
0x164c   :  { %p1033_p8 = pnand %p1032_p7, %p1026_p4 }
0x164e   :  { %1036 = shalt.err (!%p1033_p8)
}
0x164f   :  { %s1037_s18 = scalar_lea.hbm %s1317_s4, 128 }
0x1650   :  { %p1038_p9 = scmp.ne.s32.totalorder %s1317_s4, %s1037_s18  ;;  %p1041_p10 = scmp.lt.u32.totalorder %s1037_s18, %s1317_s4 }
0x1652   :  { %p1043_p11 = pnand %p1041_p10, %p1038_p9 }
0x1654   :  { %1046 = shalt.err (!%p1043_p11)
}
0x1655   :  { %737 = dma.vmem_to_hbm [thread:$0]  %s1260_s21, 128, %s1317_s4, [#allocation11]  }
0x1656   :  { %1051 = dma.done.wait [#allocation8], 1024  }
0x1657   :  { %1052 = vsyncadd [#allocation8], 4294966272 }
0x1658   :  { %1053 = dma.done.wait [#allocation11], 256  }
0x1659   :  { %1054 = vsyncadd [#allocation11], 4294967040 }
0x165a   :  { %747 = vsyncpa [#allocation7], 1 }
0x165b   :  { %748 = vsyncpa [#allocation8], 1 }
0x165c   :  { %749 = vsyncpa [#allocation11], 1 }
0x165d   :  { %750 = vsyncmov [#allocation5] }
0x1660   :  { %s751_s23 = vpop.sfrf %750 }
0x1661   :  { %p772_p12 = scmp.ne.s32.totalorder %s751_s23, 0 }
0x1663   :  { %755 = shalt.err (%p772_p12)  }

</bundles_post_ra>
